<compile_context>
chip_gen: v7x
topology: tpu7x:2x2x1
jax: 0.10.0
libtpu: 0.0.40
codegen_flags: <defaults>
</compile_context>

<pallas_src>
import functools

import jax
import jax.numpy as jnp
from jax import lax
from jax.experimental import pallas as pl
from jax.experimental.pallas import tpu as pltpu


# --------------------------------------------------------------------------
# Single fused kernel: LSTM recurrence + linear1 + (scramble-folded) linear2.
# Invoked once (no grid); the time loop is unrolled at trace time.
# --------------------------------------------------------------------------
def lstm_fused_kernel(x_ref, wih_ref, whh_ref, b_ref, w1_ref, mt_ref,
                      obias_ref, out_ref, hs_scr, *,
                      seq_len, batch, n_hidden, n_classes):
    S, B, H, C = seq_len, batch, n_hidden, n_classes

    # Loop-invariant reads, hoisted.
    w_hh = whh_ref[...]                                        # (H, 4H)

    # Input projection for all timesteps at once (bias folded in).
    xg = jnp.dot(x_ref[...], wih_ref[...],
                 preferred_element_type=jnp.float32) + b_ref[...]  # (S*B, 4H)

    h = jnp.zeros((B, H), jnp.float32)
    c = jnp.zeros((B, H), jnp.float32)

    # Fully-unrolled static time loop: static slices everywhere, full LLO
    # scheduling visibility, no per-step pipeline bookkeeping.
    for t in range(S):
        gates = xg[t * B:(t + 1) * B, :] + jnp.dot(
            h, w_hh, preferred_element_type=jnp.float32)       # (B, 4H)
        # Gate columns were pre-reordered to (i, f, o, g): one sigmoid over a
        # contiguous 3H slice, one tanh over the last H lanes.
        sig = jax.nn.sigmoid(gates[:, :3 * H])
        g_g = jnp.tanh(gates[:, 3 * H:])
        i_g = sig[:, 0 * H:1 * H]
        f_g = sig[:, 1 * H:2 * H]
        o_g = sig[:, 2 * H:3 * H]
        c = f_g * c + i_g * g_g
        h = o_g * jnp.tanh(c)
        hs_scr[t * B:(t + 1) * B, :] = h                   # history, off the
                                                           # recurrence path

    # linear1 for all timesteps in one matmul: (S*B, H) @ (H, C).
    lin1 = jnp.dot(hs_scr[...], w1_ref[...],
                   preferred_element_type=jnp.float32)          # (S*B, C)

    # linear2 with the PyTorch `.view(-1, C, S)` scramble folded into the
    # precomputed selection matrices mt (built in the wrapper); b1 and b2 are
    # folded into obias:
    #   out[j] = obias[j] + sum_{c'} ( mt[c'] @ lin1[:, c'] )[j]
    acc = obias_ref[...]                                        # (B*C, 1)
    for cp in range(C):
        acc = acc + jnp.dot(mt_ref[cp], lin1[:, cp:cp + 1],
                            preferred_element_type=jnp.float32)
    out_ref[...] = acc.astype(out_ref.dtype)


# --------------------------------------------------------------------------
# Wrapper
# --------------------------------------------------------------------------
def lstm_forward(x, params, *, n_classes, n_hidden):
    B, S, F = x.shape
    H, C = n_hidden, n_classes

    # PyTorch `x.view(seq_len, -1, n_features)` == row-major reinterpretation;
    # flattening to (S*B, F) is the same memory (free HBM reshape).
    x_flat = x.reshape(S * B, F)

    # Gate-column reorder (i,f,g,o) -> (i,f,o,g).  (Would be done once at
    # parameter-prep time in a real deployment; tiny XLA ops here.)
    def reorder(w):
        return jnp.concatenate(
            [w[..., 0:2 * H], w[..., 3 * H:4 * H], w[..., 2 * H:3 * H]],
            axis=-1)

    w_ih = reorder(params["w_ih"])
    w_hh = reorder(params["w_hh"])
    b_lstm = reorder(params["b_lstm"])

    # Fold linear2's weight and the `.view(-1, C, S)` scramble into selection
    # matrices:  out_flat[j] = out_bias[j] + sum_{c', r} mt[c', j, r] * lin1[r, c']
    # with       mt[c', j, r] = w2[r*C + c' - j*S]  if 0 <= r*C+c'-j*S < S
    #                           0                   otherwise
    # (exactly reproduces lin_out.reshape(-1).reshape(B*C, S) @ w2).
    w2 = params["w2"][:, 0]                                 # (S,)
    j_idx = jnp.arange(B * C)[None, :, None]
    r_idx = jnp.arange(S * B)[None, None, :]
    c_idx = jnp.arange(C)[:, None, None]
    s_idx = r_idx * C + c_idx - j_idx * S
    valid = (s_idx >= 0) & (s_idx < S)
    mt = jnp.where(valid, w2[jnp.clip(s_idx, 0, S - 1)],
                   0.0).astype(jnp.float32)                 # (C, B*C, S*B)

    # Fold b1 (through the scramble) and b2 into a single per-output constant:
    #   out_bias[j] = b2 + sum_{c', r} mt[c', j, r] * b1[c']
    out_bias = (params["b2"][0, 0]
                + jnp.einsum("cjr,c->j", mt, params["b1"][0])
                ).reshape(B * C, 1).astype(jnp.float32)

    out_col = pl.pallas_call(
        functools.partial(lstm_fused_kernel, seq_len=S, batch=B,
                          n_hidden=H, n_classes=C),
        out_shape=jax.ShapeDtypeStruct((B * C, 1), jnp.float32),
        in_specs=[pl.BlockSpec(memory_space=pltpu.MemorySpace.VMEM)] * 7,
        out_specs=pl.BlockSpec(memory_space=pltpu.MemorySpace.VMEM),
        scratch_shapes=[pltpu.VMEM((S * B, H), jnp.float32)],   # h_t history
    )(x_flat, w_ih, w_hh, b_lstm, params["w1"], mt, out_bias)

    # PyTorch out[:, :, 0] -> (B, C); row-major reshape of the (B*C,) result.
    return out_col.reshape(B, C)


# --------------------------------------------------------------------------
# Pure-JAX reference (original gate order, explicit reshapes) — independent
# check of the gate reorder + scramble-fold done for the kernel.
# --------------------------------------------------------------------------
def lstm_forward_ref(x, params, *, n_classes, n_hidden):
    B, S, F = x.shape
    H = n_hidden
    C = n_classes
    x_seq = x.reshape(S, B, F)

    def step(carry, x_t):
        h, c = carry
        gates = x_t @ params["w_ih"] + h @ params["w_hh"] + params["b_lstm"]
        i_g = jax.nn.sigmoid(gates[:, 0 * H:1 * H])
        f_g = jax.nn.sigmoid(gates[:, 1 * H:2 * H])
        g_g = jnp.tanh(gates[:, 2 * H:3 * H])
        o_g = jax.nn.sigmoid(gates[:, 3 * H:4 * H])
        c = f_g * c + i_g * g_g
        h = o_g * jnp.tanh(c)
        return (h, c), h

    h0 = jnp.zeros((B, H), jnp.float32)
    c0 = jnp.zeros((B, H), jnp.float32)
    _, hs = lax.scan(step, (h0, c0), x_seq)                 # (S, B, H)
    lin_out = hs @ params["w1"] + params["b1"]              # (S, B, C)
    lin_flat = lin_out.reshape(-1).reshape(B * C, S)
    out = lin_flat @ params["w2"] + params["b2"][0, 0]
    return out.reshape(B, C)


def init_params(key, n_features, n_hidden, n_classes, seq_len):
    F, H, C, S = n_features, n_hidden, n_classes, seq_len
    k = jax.random.split(key, 8)
    s_lstm = 1.0 / jnp.sqrt(H)
    s_l1 = 1.0 / jnp.sqrt(H)
    s_l2 = 1.0 / jnp.sqrt(S)
    u = lambda kk, shape, s: jax.random.uniform(kk, shape, jnp.float32, -s, s)
    # torch stores W_ih as (4H, F); we keep the transposed layout (F, 4H),
    # gate order (i, f, g, o).  b_lstm = b_ih + b_hh (exact equivalence).
    return {
        "w_ih": u(k[0], (F, 4 * H), s_lstm),
        "w_hh": u(k[1], (H, 4 * H), s_lstm),
        "b_lstm": u(k[2], (1, 4 * H), s_lstm) + u(k[3], (1, 4 * H), s_lstm),
        "w1": u(k[4], (H, C), s_l1),
        "b1": u(k[5], (1, C), s_l1),
        "w2": u(k[6], (S, 1), s_l2),
        "b2": u(k[7], (1, 1), s_l2),
    }
    # TODO(synk): dropout is identity in eval mode (and dropout=0 default), so
    # it is intentionally omitted.


if __name__ == "__main__":
    n_classes, n_features, seq_len, n_hidden = 3, 4, 8, 32
    batch = 2

    key = jax.random.PRNGKey(0)
    kx, kp = jax.random.split(key)
    x = jax.random.normal(kx, (batch, seq_len, n_features), jnp.float32)
    params = init_params(kp, n_features, n_hidden, n_classes, seq_len)

    fwd = functools.partial(lstm_forward, n_classes=n_classes,
                            n_hidden=n_hidden)
    out = jax.jit(fwd)(x, params)
    out = jax.block_until_ready(out)

    ref = lstm_forward_ref(x, params, n_classes=n_classes, n_hidden=n_hidden)
    assert out.shape == (batch, n_classes)
    assert jnp.allclose(out, ref, rtol=1e-2, atol=1e-2)

    print("KERNEL_OK")
</pallas_src>

<mosaic_0001>
module attributes {stable_mosaic.version = 11 : i64} {
  func.func @lstm_fused_kernel(%arg0: memref<16x4xf32, #tpu.memory_space<vmem>>, %arg1: memref<4x128xf32, #tpu.memory_space<vmem>>, %arg2: memref<32x128xf32, #tpu.memory_space<vmem>>, %arg3: memref<1x128xf32, #tpu.memory_space<vmem>>, %arg4: memref<32x3xf32, #tpu.memory_space<vmem>>, %arg5: memref<3x6x16xf32, #tpu.memory_space<vmem>>, %arg6: memref<6x1xf32, #tpu.memory_space<vmem>>, %arg7: memref<6x1xf32, #tpu.memory_space<vmem>>, %arg8: memref<16x32xf32, #tpu.memory_space<vmem>>) attributes {dimension_semantics = [], scalar_prefetch = 0 : i64, scratch_operands = 1 : i64, tpu.core_type = #tpu.core_type<tc>} {
    %c0 = arith.constant 0 : index
    %c0_0 = arith.constant 0 : index
    %0 = vector.load %arg2[%c0, %c0_0] : memref<32x128xf32, #tpu.memory_space<vmem>>, vector<32x128xf32>
    %c0_1 = arith.constant 0 : index
    %c0_2 = arith.constant 0 : index
    %1 = vector.load %arg0[%c0_1, %c0_2] : memref<16x4xf32, #tpu.memory_space<vmem>>, vector<16x4xf32>
    %c0_3 = arith.constant 0 : index
    %c0_4 = arith.constant 0 : index
    %2 = vector.load %arg1[%c0_3, %c0_4] : memref<4x128xf32, #tpu.memory_space<vmem>>, vector<4x128xf32>
    %cst = arith.constant dense<0.000000e+00> : vector<16x128xf32>
    %3 = tpu.matmul %1, %2, %cst {dimension_numbers = #tpu.dot_dimension_numbers<[1], [0], [0], [1], [0, 0, 1, 1], [], []>} : vector<16x4xf32>, vector<4x128xf32>, vector<16x128xf32> -> vector<16x128xf32>
    %c0_5 = arith.constant 0 : index
    %c0_6 = arith.constant 0 : index
    %4 = vector.load %arg3[%c0_5, %c0_6] : memref<1x128xf32, #tpu.memory_space<vmem>>, vector<1x128xf32>
    %5 = vector.broadcast %4 : vector<1x128xf32> to vector<16x128xf32>
    %6 = arith.addf %3, %5 : vector<16x128xf32>
    %cst_7 = arith.constant 0.000000e+00 : f32
    %7 = vector.broadcast %cst_7 : f32 to vector<2x32xf32>
    %cst_8 = arith.constant 0.000000e+00 : f32
    %8 = vector.broadcast %cst_8 : f32 to vector<2x32xf32>
    %9 = vector.extract_strided_slice %6 {offsets = [0, 0], sizes = [2, 128], strides = [1, 1]} : vector<16x128xf32> to vector<2x128xf32>
    %cst_9 = arith.constant dense<0.000000e+00> : vector<2x128xf32>
    %10 = tpu.matmul %7, %0, %cst_9 {dimension_numbers = #tpu.dot_dimension_numbers<[1], [0], [0], [1], [0, 0, 1, 1], [], []>} : vector<2x32xf32>, vector<32x128xf32>, vector<2x128xf32> -> vector<2x128xf32>
    %11 = arith.addf %9, %10 : vector<2x128xf32>
    %12 = vector.extract_strided_slice %11 {offsets = [0, 0], sizes = [2, 96], strides = [1, 1]} : vector<2x128xf32> to vector<2x96xf32>
    %13 = arith.negf %12 : vector<2x96xf32>
    %14 = math.exp %13 : vector<2x96xf32>
    %cst_10 = arith.constant 1.000000e+00 : f32
    %15 = vector.broadcast %cst_10 : f32 to vector<2x96xf32>
    %16 = arith.addf %15, %14 : vector<2x96xf32>
    %17 = arith.divf %15, %16 : vector<2x96xf32>
    %18 = vector.extract_strided_slice %11 {offsets = [0, 96], sizes = [2, 32], strides = [1, 1]} : vector<2x128xf32> to vector<2x32xf32>
    %19 = math.tanh %18 : vector<2x32xf32>
    %20 = vector.extract_strided_slice %17 {offsets = [0, 0], sizes = [2, 32], strides = [1, 1]} : vector<2x96xf32> to vector<2x32xf32>
    %21 = vector.extract_strided_slice %17 {offsets = [0, 32], sizes = [2, 32], strides = [1, 1]} : vector<2x96xf32> to vector<2x32xf32>
    %22 = vector.extract_strided_slice %17 {offsets = [0, 64], sizes = [2, 32], strides = [1, 1]} : vector<2x96xf32> to vector<2x32xf32>
    %23 = arith.mulf %21, %8 : vector<2x32xf32>
    %24 = arith.mulf %20, %19 : vector<2x32xf32>
    %25 = arith.addf %23, %24 : vector<2x32xf32>
    %26 = math.tanh %25 : vector<2x32xf32>
    %27 = arith.mulf %22, %26 : vector<2x32xf32>
    %c0_11 = arith.constant 0 : index
    %c0_12 = arith.constant 0 : index
    %28 = vector.load %arg8[%c0_11, %c0_12] : memref<16x32xf32, #tpu.memory_space<vmem>>, vector<2x32xf32>
    tpu.vector_store %arg8[%c0_11, %c0_12], %27 {strides = array<i32>} : memref<16x32xf32, #tpu.memory_space<vmem>>, vector<2x32xf32>,
    %29 = vector.extract_strided_slice %6 {offsets = [2, 0], sizes = [2, 128], strides = [1, 1]} : vector<16x128xf32> to vector<2x128xf32>
    %cst_13 = arith.constant dense<0.000000e+00> : vector<2x128xf32>
    %30 = tpu.matmul %27, %0, %cst_13 {dimension_numbers = #tpu.dot_dimension_numbers<[1], [0], [0], [1], [0, 0, 1, 1], [], []>} : vector<2x32xf32>, vector<32x128xf32>, vector<2x128xf32> -> vector<2x128xf32>
    %31 = arith.addf %29, %30 : vector<2x128xf32>
    %32 = vector.extract_strided_slice %31 {offsets = [0, 0], sizes = [2, 96], strides = [1, 1]} : vector<2x128xf32> to vector<2x96xf32>
    %33 = arith.negf %32 : vector<2x96xf32>
    %34 = math.exp %33 : vector<2x96xf32>
    %cst_14 = arith.constant 1.000000e+00 : f32
    %35 = vector.broadcast %cst_14 : f32 to vector<2x96xf32>
    %36 = arith.addf %35, %34 : vector<2x96xf32>
    %37 = arith.divf %35, %36 : vector<2x96xf32>
    %38 = vector.extract_strided_slice %31 {offsets = [0, 96], sizes = [2, 32], strides = [1, 1]} : vector<2x128xf32> to vector<2x32xf32>
    %39 = math.tanh %38 : vector<2x32xf32>
    %40 = vector.extract_strided_slice %37 {offsets = [0, 0], sizes = [2, 32], strides = [1, 1]} : vector<2x96xf32> to vector<2x32xf32>
    %41 = vector.extract_strided_slice %37 {offsets = [0, 32], sizes = [2, 32], strides = [1, 1]} : vector<2x96xf32> to vector<2x32xf32>
    %42 = vector.extract_strided_slice %37 {offsets = [0, 64], sizes = [2, 32], strides = [1, 1]} : vector<2x96xf32> to vector<2x32xf32>
    %43 = arith.mulf %41, %25 : vector<2x32xf32>
    %44 = arith.mulf %40, %39 : vector<2x32xf32>
    %45 = arith.addf %43, %44 : vector<2x32xf32>
    %46 = math.tanh %45 : vector<2x32xf32>
    %47 = arith.mulf %42, %46 : vector<2x32xf32>
    %c2 = arith.constant 2 : index
    %c0_15 = arith.constant 0 : index
    %48 = vector.load %arg8[%c2, %c0_15] : memref<16x32xf32, #tpu.memory_space<vmem>>, vector<2x32xf32>
    tpu.vector_store %arg8[%c2, %c0_15], %47 {strides = array<i32>} : memref<16x32xf32, #tpu.memory_space<vmem>>, vector<2x32xf32>,
    %49 = vector.extract_strided_slice %6 {offsets = [4, 0], sizes = [2, 128], strides = [1, 1]} : vector<16x128xf32> to vector<2x128xf32>
    %cst_16 = arith.constant dense<0.000000e+00> : vector<2x128xf32>
    %50 = tpu.matmul %47, %0, %cst_16 {dimension_numbers = #tpu.dot_dimension_numbers<[1], [0], [0], [1], [0, 0, 1, 1], [], []>} : vector<2x32xf32>, vector<32x128xf32>, vector<2x128xf32> -> vector<2x128xf32>
    %51 = arith.addf %49, %50 : vector<2x128xf32>
    %52 = vector.extract_strided_slice %51 {offsets = [0, 0], sizes = [2, 96], strides = [1, 1]} : vector<2x128xf32> to vector<2x96xf32>
    %53 = arith.negf %52 : vector<2x96xf32>
    %54 = math.exp %53 : vector<2x96xf32>
    %cst_17 = arith.constant 1.000000e+00 : f32
    %55 = vector.broadcast %cst_17 : f32 to vector<2x96xf32>
    %56 = arith.addf %55, %54 : vector<2x96xf32>
    %57 = arith.divf %55, %56 : vector<2x96xf32>
    %58 = vector.extract_strided_slice %51 {offsets = [0, 96], sizes = [2, 32], strides = [1, 1]} : vector<2x128xf32> to vector<2x32xf32>
    %59 = math.tanh %58 : vector<2x32xf32>
    %60 = vector.extract_strided_slice %57 {offsets = [0, 0], sizes = [2, 32], strides = [1, 1]} : vector<2x96xf32> to vector<2x32xf32>
    %61 = vector.extract_strided_slice %57 {offsets = [0, 32], sizes = [2, 32], strides = [1, 1]} : vector<2x96xf32> to vector<2x32xf32>
    %62 = vector.extract_strided_slice %57 {offsets = [0, 64], sizes = [2, 32], strides = [1, 1]} : vector<2x96xf32> to vector<2x32xf32>
    %63 = arith.mulf %61, %45 : vector<2x32xf32>
    %64 = arith.mulf %60, %59 : vector<2x32xf32>
    %65 = arith.addf %63, %64 : vector<2x32xf32>
    %66 = math.tanh %65 : vector<2x32xf32>
    %67 = arith.mulf %62, %66 : vector<2x32xf32>
    %c4 = arith.constant 4 : index
    %c0_18 = arith.constant 0 : index
    %68 = vector.load %arg8[%c4, %c0_18] : memref<16x32xf32, #tpu.memory_space<vmem>>, vector<2x32xf32>
    tpu.vector_store %arg8[%c4, %c0_18], %67 {strides = array<i32>} : memref<16x32xf32, #tpu.memory_space<vmem>>, vector<2x32xf32>,
    %69 = vector.extract_strided_slice %6 {offsets = [6, 0], sizes = [2, 128], strides = [1, 1]} : vector<16x128xf32> to vector<2x128xf32>
    %cst_19 = arith.constant dense<0.000000e+00> : vector<2x128xf32>
    %70 = tpu.matmul %67, %0, %cst_19 {dimension_numbers = #tpu.dot_dimension_numbers<[1], [0], [0], [1], [0, 0, 1, 1], [], []>} : vector<2x32xf32>, vector<32x128xf32>, vector<2x128xf32> -> vector<2x128xf32>
    %71 = arith.addf %69, %70 : vector<2x128xf32>
    %72 = vector.extract_strided_slice %71 {offsets = [0, 0], sizes = [2, 96], strides = [1, 1]} : vector<2x128xf32> to vector<2x96xf32>
    %73 = arith.negf %72 : vector<2x96xf32>
    %74 = math.exp %73 : vector<2x96xf32>
    %cst_20 = arith.constant 1.000000e+00 : f32
    %75 = vector.broadcast %cst_20 : f32 to vector<2x96xf32>
    %76 = arith.addf %75, %74 : vector<2x96xf32>
    %77 = arith.divf %75, %76 : vector<2x96xf32>
    %78 = vector.extract_strided_slice %71 {offsets = [0, 96], sizes = [2, 32], strides = [1, 1]} : vector<2x128xf32> to vector<2x32xf32>
    %79 = math.tanh %78 : vector<2x32xf32>
    %80 = vector.extract_strided_slice %77 {offsets = [0, 0], sizes = [2, 32], strides = [1, 1]} : vector<2x96xf32> to vector<2x32xf32>
    %81 = vector.extract_strided_slice %77 {offsets = [0, 32], sizes = [2, 32], strides = [1, 1]} : vector<2x96xf32> to vector<2x32xf32>
    %82 = vector.extract_strided_slice %77 {offsets = [0, 64], sizes = [2, 32], strides = [1, 1]} : vector<2x96xf32> to vector<2x32xf32>
    %83 = arith.mulf %81, %65 : vector<2x32xf32>
    %84 = arith.mulf %80, %79 : vector<2x32xf32>
    %85 = arith.addf %83, %84 : vector<2x32xf32>
    %86 = math.tanh %85 : vector<2x32xf32>
    %87 = arith.mulf %82, %86 : vector<2x32xf32>
    %c6 = arith.constant 6 : index
    %c0_21 = arith.constant 0 : index
    %88 = vector.load %arg8[%c6, %c0_21] : memref<16x32xf32, #tpu.memory_space<vmem>>, vector<2x32xf32>
    tpu.vector_store %arg8[%c6, %c0_21], %87 {strides = array<i32>} : memref<16x32xf32, #tpu.memory_space<vmem>>, vector<2x32xf32>,
    %89 = vector.extract_strided_slice %6 {offsets = [8, 0], sizes = [2, 128], strides = [1, 1]} : vector<16x128xf32> to vector<2x128xf32>
    %cst_22 = arith.constant dense<0.000000e+00> : vector<2x128xf32>
    %90 = tpu.matmul %87, %0, %cst_22 {dimension_numbers = #tpu.dot_dimension_numbers<[1], [0], [0], [1], [0, 0, 1, 1], [], []>} : vector<2x32xf32>, vector<32x128xf32>, vector<2x128xf32> -> vector<2x128xf32>
    %91 = arith.addf %89, %90 : vector<2x128xf32>
    %92 = vector.extract_strided_slice %91 {offsets = [0, 0], sizes = [2, 96], strides = [1, 1]} : vector<2x128xf32> to vector<2x96xf32>
    %93 = arith.negf %92 : vector<2x96xf32>
    %94 = math.exp %93 : vector<2x96xf32>
    %cst_23 = arith.constant 1.000000e+00 : f32
    %95 = vector.broadcast %cst_23 : f32 to vector<2x96xf32>
    %96 = arith.addf %95, %94 : vector<2x96xf32>
    %97 = arith.divf %95, %96 : vector<2x96xf32>
    %98 = vector.extract_strided_slice %91 {offsets = [0, 96], sizes = [2, 32], strides = [1, 1]} : vector<2x128xf32> to vector<2x32xf32>
    %99 = math.tanh %98 : vector<2x32xf32>
    %100 = vector.extract_strided_slice %97 {offsets = [0, 0], sizes = [2, 32], strides = [1, 1]} : vector<2x96xf32> to vector<2x32xf32>
    %101 = vector.extract_strided_slice %97 {offsets = [0, 32], sizes = [2, 32], strides = [1, 1]} : vector<2x96xf32> to vector<2x32xf32>
    %102 = vector.extract_strided_slice %97 {offsets = [0, 64], sizes = [2, 32], strides = [1, 1]} : vector<2x96xf32> to vector<2x32xf32>
    %103 = arith.mulf %101, %85 : vector<2x32xf32>
    %104 = arith.mulf %100, %99 : vector<2x32xf32>
    %105 = arith.addf %103, %104 : vector<2x32xf32>
    %106 = math.tanh %105 : vector<2x32xf32>
    %107 = arith.mulf %102, %106 : vector<2x32xf32>
    %c8 = arith.constant 8 : index
    %c0_24 = arith.constant 0 : index
    %108 = vector.load %arg8[%c8, %c0_24] : memref<16x32xf32, #tpu.memory_space<vmem>>, vector<2x32xf32>
    tpu.vector_store %arg8[%c8, %c0_24], %107 {strides = array<i32>} : memref<16x32xf32, #tpu.memory_space<vmem>>, vector<2x32xf32>,
    %109 = vector.extract_strided_slice %6 {offsets = [10, 0], sizes = [2, 128], strides = [1, 1]} : vector<16x128xf32> to vector<2x128xf32>
    %cst_25 = arith.constant dense<0.000000e+00> : vector<2x128xf32>
    %110 = tpu.matmul %107, %0, %cst_25 {dimension_numbers = #tpu.dot_dimension_numbers<[1], [0], [0], [1], [0, 0, 1, 1], [], []>} : vector<2x32xf32>, vector<32x128xf32>, vector<2x128xf32> -> vector<2x128xf32>
    %111 = arith.addf %109, %110 : vector<2x128xf32>
    %112 = vector.extract_strided_slice %111 {offsets = [0, 0], sizes = [2, 96], strides = [1, 1]} : vector<2x128xf32> to vector<2x96xf32>
    %113 = arith.negf %112 : vector<2x96xf32>
    %114 = math.exp %113 : vector<2x96xf32>
    %cst_26 = arith.constant 1.000000e+00 : f32
    %115 = vector.broadcast %cst_26 : f32 to vector<2x96xf32>
    %116 = arith.addf %115, %114 : vector<2x96xf32>
    %117 = arith.divf %115, %116 : vector<2x96xf32>
    %118 = vector.extract_strided_slice %111 {offsets = [0, 96], sizes = [2, 32], strides = [1, 1]} : vector<2x128xf32> to vector<2x32xf32>
    %119 = math.tanh %118 : vector<2x32xf32>
    %120 = vector.extract_strided_slice %117 {offsets = [0, 0], sizes = [2, 32], strides = [1, 1]} : vector<2x96xf32> to vector<2x32xf32>
    %121 = vector.extract_strided_slice %117 {offsets = [0, 32], sizes = [2, 32], strides = [1, 1]} : vector<2x96xf32> to vector<2x32xf32>
    %122 = vector.extract_strided_slice %117 {offsets = [0, 64], sizes = [2, 32], strides = [1, 1]} : vector<2x96xf32> to vector<2x32xf32>
    %123 = arith.mulf %121, %105 : vector<2x32xf32>
    %124 = arith.mulf %120, %119 : vector<2x32xf32>
    %125 = arith.addf %123, %124 : vector<2x32xf32>
    %126 = math.tanh %125 : vector<2x32xf32>
    %127 = arith.mulf %122, %126 : vector<2x32xf32>
    %c10 = arith.constant 10 : index
    %c0_27 = arith.constant 0 : index
    %128 = vector.load %arg8[%c10, %c0_27] : memref<16x32xf32, #tpu.memory_space<vmem>>, vector<2x32xf32>
    tpu.vector_store %arg8[%c10, %c0_27], %127 {strides = array<i32>} : memref<16x32xf32, #tpu.memory_space<vmem>>, vector<2x32xf32>,
    %129 = vector.extract_strided_slice %6 {offsets = [12, 0], sizes = [2, 128], strides = [1, 1]} : vector<16x128xf32> to vector<2x128xf32>
    %cst_28 = arith.constant dense<0.000000e+00> : vector<2x128xf32>
    %130 = tpu.matmul %127, %0, %cst_28 {dimension_numbers = #tpu.dot_dimension_numbers<[1], [0], [0], [1], [0, 0, 1, 1], [], []>} : vector<2x32xf32>, vector<32x128xf32>, vector<2x128xf32> -> vector<2x128xf32>
    %131 = arith.addf %129, %130 : vector<2x128xf32>
    %132 = vector.extract_strided_slice %131 {offsets = [0, 0], sizes = [2, 96], strides = [1, 1]} : vector<2x128xf32> to vector<2x96xf32>
    %133 = arith.negf %132 : vector<2x96xf32>
    %134 = math.exp %133 : vector<2x96xf32>
    %cst_29 = arith.constant 1.000000e+00 : f32
    %135 = vector.broadcast %cst_29 : f32 to vector<2x96xf32>
    %136 = arith.addf %135, %134 : vector<2x96xf32>
    %137 = arith.divf %135, %136 : vector<2x96xf32>
    %138 = vector.extract_strided_slice %131 {offsets = [0, 96], sizes = [2, 32], strides = [1, 1]} : vector<2x128xf32> to vector<2x32xf32>
    %139 = math.tanh %138 : vector<2x32xf32>
    %140 = vector.extract_strided_slice %137 {offsets = [0, 0], sizes = [2, 32], strides = [1, 1]} : vector<2x96xf32> to vector<2x32xf32>
    %141 = vector.extract_strided_slice %137 {offsets = [0, 32], sizes = [2, 32], strides = [1, 1]} : vector<2x96xf32> to vector<2x32xf32>
    %142 = vector.extract_strided_slice %137 {offsets = [0, 64], sizes = [2, 32], strides = [1, 1]} : vector<2x96xf32> to vector<2x32xf32>
    %143 = arith.mulf %141, %125 : vector<2x32xf32>
    %144 = arith.mulf %140, %139 : vector<2x32xf32>
    %145 = arith.addf %143, %144 : vector<2x32xf32>
    %146 = math.tanh %145 : vector<2x32xf32>
    %147 = arith.mulf %142, %146 : vector<2x32xf32>
    %c12 = arith.constant 12 : index
    %c0_30 = arith.constant 0 : index
    %148 = vector.load %arg8[%c12, %c0_30] : memref<16x32xf32, #tpu.memory_space<vmem>>, vector<2x32xf32>
    tpu.vector_store %arg8[%c12, %c0_30], %147 {strides = array<i32>} : memref<16x32xf32, #tpu.memory_space<vmem>>, vector<2x32xf32>,
    %149 = vector.extract_strided_slice %6 {offsets = [14, 0], sizes = [2, 128], strides = [1, 1]} : vector<16x128xf32> to vector<2x128xf32>
    %cst_31 = arith.constant dense<0.000000e+00> : vector<2x128xf32>
    %150 = tpu.matmul %147, %0, %cst_31 {dimension_numbers = #tpu.dot_dimension_numbers<[1], [0], [0], [1], [0, 0, 1, 1], [], []>} : vector<2x32xf32>, vector<32x128xf32>, vector<2x128xf32> -> vector<2x128xf32>
    %151 = arith.addf %149, %150 : vector<2x128xf32>
    %152 = vector.extract_strided_slice %151 {offsets = [0, 0], sizes = [2, 96], strides = [1, 1]} : vector<2x128xf32> to vector<2x96xf32>
    %153 = arith.negf %152 : vector<2x96xf32>
    %154 = math.exp %153 : vector<2x96xf32>
    %cst_32 = arith.constant 1.000000e+00 : f32
    %155 = vector.broadcast %cst_32 : f32 to vector<2x96xf32>
    %156 = arith.addf %155, %154 : vector<2x96xf32>
    %157 = arith.divf %155, %156 : vector<2x96xf32>
    %158 = vector.extract_strided_slice %151 {offsets = [0, 96], sizes = [2, 32], strides = [1, 1]} : vector<2x128xf32> to vector<2x32xf32>
    %159 = math.tanh %158 : vector<2x32xf32>
    %160 = vector.extract_strided_slice %157 {offsets = [0, 0], sizes = [2, 32], strides = [1, 1]} : vector<2x96xf32> to vector<2x32xf32>
    %161 = vector.extract_strided_slice %157 {offsets = [0, 32], sizes = [2, 32], strides = [1, 1]} : vector<2x96xf32> to vector<2x32xf32>
    %162 = vector.extract_strided_slice %157 {offsets = [0, 64], sizes = [2, 32], strides = [1, 1]} : vector<2x96xf32> to vector<2x32xf32>
    %163 = arith.mulf %161, %145 : vector<2x32xf32>
    %164 = arith.mulf %160, %159 : vector<2x32xf32>
    %165 = arith.addf %163, %164 : vector<2x32xf32>
    %166 = math.tanh %165 : vector<2x32xf32>
    %167 = arith.mulf %162, %166 : vector<2x32xf32>
    %c14 = arith.constant 14 : index
    %c0_33 = arith.constant 0 : index
    %168 = vector.load %arg8[%c14, %c0_33] : memref<16x32xf32, #tpu.memory_space<vmem>>, vector<2x32xf32>
    tpu.vector_store %arg8[%c14, %c0_33], %167 {strides = array<i32>} : memref<16x32xf32, #tpu.memory_space<vmem>>, vector<2x32xf32>,
    %c0_34 = arith.constant 0 : index
    %c0_35 = arith.constant 0 : index
    %169 = vector.load %arg8[%c0_34, %c0_35] : memref<16x32xf32, #tpu.memory_space<vmem>>, vector<16x32xf32>
    %c0_36 = arith.constant 0 : index
    %c0_37 = arith.constant 0 : index
    %170 = vector.load %arg4[%c0_36, %c0_37] : memref<32x3xf32, #tpu.memory_space<vmem>>, vector<32x3xf32>
    %cst_38 = arith.constant dense<0.000000e+00> : vector<16x3xf32>
    %171 = tpu.matmul %169, %170, %cst_38 {dimension_numbers = #tpu.dot_dimension_numbers<[1], [0], [0], [1], [0, 0, 1, 1], [], []>} : vector<16x32xf32>, vector<32x3xf32>, vector<16x3xf32> -> vector<16x3xf32>
    %c0_39 = arith.constant 0 : index
    %c0_40 = arith.constant 0 : index
    %172 = vector.load %arg6[%c0_39, %c0_40] : memref<6x1xf32, #tpu.memory_space<vmem>>, vector<6x1xf32>
    %c0_41 = arith.constant 0 : index
    %c0_42 = arith.constant 0 : index
    %c0_43 = arith.constant 0 : index
    %173 = vector.load %arg5[%c0_41, %c0_42, %c0_43] : memref<3x6x16xf32, #tpu.memory_space<vmem>>, vector<1x6x16xf32>
    %174 = vector.shape_cast %173 : vector<1x6x16xf32> to vector<6x16xf32>
    %175 = vector.extract_strided_slice %171 {offsets = [0, 0], sizes = [16, 1], strides = [1, 1]} : vector<16x3xf32> to vector<16x1xf32>
    %cst_44 = arith.constant dense<0.000000e+00> : vector<6x1xf32>
    %176 = tpu.matmul %174, %175, %cst_44 {dimension_numbers = #tpu.dot_dimension_numbers<[1], [0], [0], [1], [0, 0, 1, 1], [], []>} : vector<6x16xf32>, vector<16x1xf32>, vector<6x1xf32> -> vector<6x1xf32>
    %177 = arith.addf %172, %176 : vector<6x1xf32>
    %c1 = arith.constant 1 : index
    %c0_45 = arith.constant 0 : index
    %c0_46 = arith.constant 0 : index
    %178 = vector.load %arg5[%c1, %c0_45, %c0_46] : memref<3x6x16xf32, #tpu.memory_space<vmem>>, vector<1x6x16xf32>
    %179 = vector.shape_cast %178 : vector<1x6x16xf32> to vector<6x16xf32>
    %180 = vector.extract_strided_slice %171 {offsets = [0, 1], sizes = [16, 1], strides = [1, 1]} : vector<16x3xf32> to vector<16x1xf32>
    %cst_47 = arith.constant dense<0.000000e+00> : vector<6x1xf32>
    %181 = tpu.matmul %179, %180, %cst_47 {dimension_numbers = #tpu.dot_dimension_numbers<[1], [0], [0], [1], [0, 0, 1, 1], [], []>} : vector<6x16xf32>, vector<16x1xf32>, vector<6x1xf32> -> vector<6x1xf32>
    %182 = arith.addf %177, %181 : vector<6x1xf32>
    %c2_48 = arith.constant 2 : index
    %c0_49 = arith.constant 0 : index
    %c0_50 = arith.constant 0 : index
    %183 = vector.load %arg5[%c2_48, %c0_49, %c0_50] : memref<3x6x16xf32, #tpu.memory_space<vmem>>, vector<1x6x16xf32>
    %184 = vector.shape_cast %183 : vector<1x6x16xf32> to vector<6x16xf32>
    %185 = vector.extract_strided_slice %171 {offsets = [0, 2], sizes = [16, 1], strides = [1, 1]} : vector<16x3xf32> to vector<16x1xf32>
    %cst_51 = arith.constant dense<0.000000e+00> : vector<6x1xf32>
    %186 = tpu.matmul %184, %185, %cst_51 {dimension_numbers = #tpu.dot_dimension_numbers<[1], [0], [0], [1], [0, 0, 1, 1], [], []>} : vector<6x16xf32>, vector<16x1xf32>, vector<6x1xf32> -> vector<6x1xf32>
    %187 = arith.addf %182, %186 : vector<6x1xf32>
    %c0_52 = arith.constant 0 : index
    %c0_53 = arith.constant 0 : index
    %188 = vector.load %arg7[%c0_52, %c0_53] : memref<6x1xf32, #tpu.memory_space<vmem>>, vector<6x1xf32>
    tpu.vector_store %arg7[%c0_52, %c0_53], %187 {strides = array<i32>} : memref<6x1xf32, #tpu.memory_space<vmem>>, vector<6x1xf32>,
    return
  }
}

</mosaic_0001>

<bundles_post_ra>
// kernel: lstm_forward.1
= control target key start
LH: loop header
LB: loop body
LE: loop exit
PB: predicated region body
PF: predicated region fallthrough
CT: control target
= control target key end

     0   :  { %vm47_vm0 = vcmask 1043456   ;;  %vm40_vm1 = vcmask 31744   ;;  %v1698_v3 = vmov 0.0|0.0   ;;  %vm1699_vm2 = vmmov 0   ;;  %s1701_s14 = smov 32   ;;  %s1704_s23 = smov 127   ;;  %s1945_s1 = inlined_call_operand.vmem [shape: f32[4,128], index: 1, kind: input, shape index: {}]   ;;  %s1946_s0 = inlined_call_operand.vmem [shape: f32[16,4], index: 0, kind: input, shape index: {}]   ;;  %s1947_s2 = inlined_call_operand.vmem [shape: f32[32,128], index: 2, kind: input, shape index: {}]   ;;  %s1948_s3 = inlined_call_operand.vmem [shape: f32[1,128], index: 3, kind: input, shape index: {}]   ;;  %s1949_s4 = inlined_call_operand.vmem [shape: f32[32,3], index: 4, kind: input, shape index: {}]   ;;  %s1950_s5 = inlined_call_operand.vmem [shape: f32[3,6,16], index: 5, kind: input, shape index: {}]   ;;  %s1951_s6 = inlined_call_operand.vmem [shape: f32[6,1], index: 6, kind: input, shape index: {}]   ;;  %s1952_s7 = inlined_call_operand.vmem [shape: f32[6,1], index: 7, kind: output, shape index: {}]  }
   0x1   :  { %v32_v0 = vld [vmem:[%s1945_s1] sm:$0xf]  ;;  %v31_v2 = vld [vmem:[%s1946_s0 + $0x8] sm:$0xff]  ;;  %1553 = vmatprep.subr.bf16.mxu0 %v1698_v3  ;;  %v28_v6 = vld [vmem:[%s1947_s2 + $0x10] sm:$0xff]  ;;  %v1700_v9 = vmov 0.0   ;;  %vm229_vm3 = vcmask 254976  }
   0x2   :  { %v30_v1 = vld [vmem:[%s1946_s0] sm:$0xff]  ;;  %1422 = vmatprep.subr.msk.mxu1 %vm47_vm0, %v32_v0  ;;  %v27_v5 = vld [vmem:[%s1947_s2 + $0x8] sm:$0xff]  ;;  %v29_v8 = vld [vmem:[%s1947_s2 + $0x18] sm:$0xff]  ;;  %1446 = vmatprep.mubr.msk.f32.mxu0 %vm1699_vm2, %v1700_v9  ;;  %vm126_vm4 = vcmask 261120   ;;  %vm338_vm5 = vcmask 257026   ;;  %vm562_vm6 = vcmask 261126  }
   0x3   :  { %1424 = vmatprep.mubr.msk.f32.mxu1 %vm40_vm1, %v30_v1  ;;  %v26_v4 = vld [vmem:[%s1947_s2] sm:$0xff]  ;;  %1423 = vmatpush3.msk.msra.mxu1 %vm47_vm0, %v32_v0  ;;  %v1775_v10 = vpack.c.bf16 %v29_v8, %v28_v6  ;;  %vm450_vm7 = vcmask 259076   ;;  %vm1091_vm8 = vcmask 130048   ;;  %vm1332_vm9 = vcmask 5120  }
   0x4   :  { %v1765_v7 = vpack.c.bf16 %v27_v5, %v26_v4  ;;  %1425 = vmatmul.mubr.msk.f32.vlgmr.msra.gmra.mrb[0].mxu1 %vm40_vm1, %v31_v2  ;;  %1547 = vmatprep.subr.bf16.mxu1 %v1698_v3  ;;  %v1338_v11 = vld [vmem:[%s1948_s3] ss:$0 sm:$0xff]  ;;  %s1702_s3 = smov 64  }
   0x5   :  { %1435 = vmatprep.mubr.msk.f32.mxu1 %vm1699_vm2, %v1700_v9 }
   0x6   :  { %1549 = vmatpush3.bf16.msra.mxu1 %v1765_v7  ;;  %1555 = vmatpush3.bf16.msra.mxu0 %v1765_v7 }
   0x7   :  { %1550 = vmatprep.subr.bf16.mxu1 %v1698_v3  ;;  %1556 = vmatprep.subr.bf16.mxu0 %v1698_v3 }
   0xa   :  { %1552 = vmatpush3.bf16.msra.mxu1 %v1775_v10  ;;  %1558 = vmatpush3.bf16.msra.mxu0 %v1775_v10 }
   0xb   :  { %1559 = vmatprep.subr.bf16.mxu1 %v1698_v3  ;;  %1565 = vmatprep.subr.bf16.mxu0 %v1698_v3 }
   0xd   :  { %1436 = vmatmul.mubr.f32.vlgmr.msra.gmra.mrb[2].mxu1 %v1700_v9 }
   0xe   :  { %1561 = vmatpush3.bf16.msra.mxu1 %v1765_v7  ;;  %1457 = vmatprep.mubr.msk.f32.mxu1 %vm1699_vm2, %v1700_v9 }
   0xf   :  { %1562 = vmatprep.subr.bf16.mxu1 %v1698_v3 }
  0x12   :  { %1564 = vmatpush3.bf16.msra.mxu1 %v1775_v10 }
  0x13   :  { %1571 = vmatprep.subr.bf16.mxu1 %v1698_v3 }
  0xd7   :  { %v1426_v12 = vpop.f32.mrb[0].mxu1 }
  0xd8   :  { %v1796_v13 = vadd.f32 %v1426_v12, %v1338_v11  ;;  %v117_v14 = vpop.f32.mrb[1].mxu1 }
  0xd9   :  { %v1798_v15 = vadd.f32 %v1338_v11, %v117_v14 }
  0xe0   :  { %v196_v16 = vpop.f32.mrb[2].mxu1 }
  0xe1   :  { %v200_v17 = vadd.f32 %v196_v16, %v1798_v15  ;;  %v1437_v18 = vpop.f32.mrb[3].mxu1 }
  0xe3   :  { %1634 = vtanh.f32 %v200_v17  ;;  %v1342_v20 = vmul.f32 -1.442695, %v200_v17 }
  0xe5   :  { %1636 = vpow2.f32 %v1342_v20 }
  0xed   :  { %v1635_v19 = vpop.eup %1634 }
  0xee   :  { %210 = vrot.lane.b32.xlu0 %v1635_v19, %s1701_s14 }
  0xef   :  { %v1637_v21 = vpop.eup %1636 }
  0xf0   :  { %v204_v22 = vadd.f32 1.0, %v1637_v21 }
  0xf2   :  { %1638 = vrcp.f32 %v204_v22 }
  0xfc   :  { %v1639_v23 = vpop.eup %1638 }
  0xfd   :  { %v208_v26 = vmul.f32 0.0, %v1639_v23 }
 0x160   :  { %v211_v24 = vpop.permute.xlu0 %210 }
 0x161   :  { %v213_v25 = vmul.f32 %v1639_v23, %v211_v24 }
 0x163   :  { %215 = vrot.lane.b32.xlu0 %v213_v25, %s1701_s14 }
 0x1d5   :  { %v216_v27 = vpop.permute.xlu0 %215 }
 0x1d6   :  { %v218_v28 = vadd.f32 %v216_v27, %v208_v26 }
 0x1d8   :  { %1640 = vtanh.f32 %v218_v28  ;;  %v315_v44 = vrot.slane %v218_v28, 6 }
 0x1e2   :  { %v1641_v29 = vpop.eup %1640 }
 0x1e3   :  { %221 = vrot.lane.b32.xlu1 %v1641_v29, %s1701_s14 }
 0x255   :  { %v222_v30 = vpop.permute.xlu1 %221 }
 0x256   :  { %v224_v31 = vmul.f32 %v1639_v23, %v222_v30 }
 0x258   :  { %226 = vrot.lane.b32.xlu1 %v224_v31, %s1702_s3 }
 0x2ca   :  { %v227_v32 = vpop.permute.xlu1 %226 }
 0x2cb   :  { %230 = vst.msk [vmem:[#allocation2] sm:$0x3] %vm229_vm3, %v227_v32  ;;  %1447 = vmatmul.mubr.msk.f32.vlgmr.msra.gmra.mrb[0].mxu0 %vm126_vm4, %v227_v32 }
 0x2cc   :  { %1567 = vmatpush3.bf16.msra.mxu0 %v1765_v7  ;;  %1468 = vmatprep.mubr.msk.f32.mxu0 %vm1699_vm2, %v1700_v9 }
 0x2cd   :  { %1568 = vmatprep.subr.bf16.mxu0 %v1698_v3 }
 0x2d0   :  { %1570 = vmatpush3.bf16.msra.mxu0 %v1775_v10 }
 0x2d1   :  { %1577 = vmatprep.subr.bf16.mxu0 %v1698_v3 }
 0x39e   :  { %v299_v33 = vpop.f32.mrb[0].mxu0 }
 0x39f   :  { %v304_v34 = vrot.slane %v299_v33, 6  ;;  %v1448_v35 = vpop.f32.mrb[1].mxu0 }
 0x3a1   :  { %v306_v36 = vadd.f32 %v304_v34, %v1798_v15 }
 0x3a3   :  { %1642 = vtanh.f32 %v306_v36  ;;  %v1344_v38 = vmul.f32 -1.442695, %v306_v36 }
 0x3a5   :  { %1644 = vpow2.f32 %v1344_v38 }
 0x3ad   :  { %v1643_v37 = vpop.eup %1642 }
 0x3ae   :  { %319 = vrot.lane.b32.xlu0 %v1643_v37, %s1701_s14 }
 0x3af   :  { %v1645_v39 = vpop.eup %1644 }
 0x3b0   :  { %v310_v40 = vadd.f32 1.0, %v1645_v39 }
 0x3b2   :  { %1646 = vrcp.f32 %v310_v40 }
 0x3bc   :  { %v1647_v41 = vpop.eup %1646 }
 0x3bd   :  { %v317_v45 = vmul.f32 %v1647_v41, %v315_v44 }
 0x420   :  { %v320_v42 = vpop.permute.xlu0 %319 }
 0x421   :  { %v322_v43 = vmul.f32 %v1647_v41, %v320_v42 }
 0x423   :  { %324 = vrot.lane.b32.xlu1 %v322_v43, %s1701_s14 }
 0x495   :  { %v325_v46 = vpop.permute.xlu1 %324 }
 0x496   :  { %v327_v47 = vadd.f32 %v325_v46, %v317_v45 }
 0x498   :  { %1648 = vtanh.f32 %v327_v47  ;;  %v427_v0 = vrot.slane %v327_v47, 6 }
 0x4a2   :  { %v1649_v48 = vpop.eup %1648 }
 0x4a3   :  { %330 = vrot.lane.b32.xlu0 %v1649_v48, %s1701_s14 }
 0x515   :  { %v331_v49 = vpop.permute.xlu0 %330 }
 0x516   :  { %v1817_v50 = vmul.f32 %v1647_v41, %v331_v49 }
 0x518   :  { %v340_v51 = vrot.slane %v1817_v50, 2 }
 0x51a   :  { %341 = vrot.lane.b32.xlu1 %v340_v51, %s1702_s3 }
 0x58c   :  { %v342_v52 = vpop.permute.xlu1 %341 }
 0x58d   :  { %1458 = vmatmul.mubr.msk.f32.vlgmr.msra.gmra.mrb[4].mxu1 %vm126_vm4, %v342_v52 }
 0x58e   :  { %1573 = vmatpush3.bf16.msra.mxu1 %v1765_v7  ;;  %1479 = vmatprep.mubr.msk.f32.mxu1 %vm1699_vm2, %v1700_v9 }
 0x58f   :  { %1574 = vmatprep.subr.bf16.mxu1 %v1698_v3 }
 0x592   :  { %1576 = vmatpush3.bf16.msra.mxu1 %v1775_v10 }
 0x593   :  { %1583 = vmatprep.subr.bf16.mxu1 %v1698_v3 }
 0x660   :  { %v411_v53 = vpop.f32.mrb[4].mxu1 }
 0x661   :  { %v416_v54 = vrot.slane %v411_v53, 4  ;;  %v1459_v55 = vpop.f32.mrb[5].mxu1 }
 0x663   :  { %v418_v56 = vadd.f32 %v416_v54, %v1798_v15 }
 0x665   :  { %1650 = vtanh.f32 %v418_v56  ;;  %v1346_v58 = vmul.f32 -1.442695, %v418_v56 }
 0x667   :  { %1652 = vpow2.f32 %v1346_v58 }
 0x66f   :  { %v1651_v57 = vpop.eup %1650 }
 0x670   :  { %431 = vrot.lane.b32.xlu0 %v1651_v57, %s1701_s14 }
 0x671   :  { %v1653_v59 = vpop.eup %1652 }
 0x672   :  { %v422_v60 = vadd.f32 1.0, %v1653_v59 }
 0x674   :  { %1654 = vrcp.f32 %v422_v60 }
 0x67e   :  { %v1655_v61 = vpop.eup %1654 }
 0x67f   :  { %v429_v1 = vmul.f32 %v1655_v61, %v427_v0 }
 0x6e2   :  { %v432_v62 = vpop.permute.xlu0 %431 }
 0x6e3   :  { %v434_v63 = vmul.f32 %v1655_v61, %v432_v62 }
 0x6e5   :  { %436 = vrot.lane.b32.xlu1 %v434_v63, %s1701_s14 }
 0x757   :  { %v437_v2 = vpop.permute.xlu1 %436 }
 0x758   :  { %v439_v4 = vadd.f32 %v437_v2, %v429_v1 }
 0x75a   :  { %1656 = vtanh.f32 %v439_v4  ;;  %v539_v26 = vrot.slane %v439_v4, 6 }
 0x764   :  { %v1657_v5 = vpop.eup %1656 }
 0x765   :  { %442 = vrot.lane.b32.xlu0 %v1657_v5, %s1701_s14 }
 0x7d7   :  { %v443_v6 = vpop.permute.xlu0 %442 }
 0x7d8   :  { %v1832_v8 = vmul.f32 %v1655_v61, %v443_v6 }
 0x7da   :  { %v452_v11 = vrot.slane %v1832_v8, 4 }
 0x7dc   :  { %453 = vrot.lane.b32.xlu1 %v452_v11, %s1702_s3 }
 0x84e   :  { %v454_v12 = vpop.permute.xlu1 %453 }
 0x84f   :  { %1469 = vmatmul.mubr.msk.f32.vlgmr.msra.gmra.mrb[2].mxu0 %vm126_vm4, %v454_v12 }
 0x850   :  { %1579 = vmatpush3.bf16.msra.mxu0 %v1765_v7  ;;  %1490 = vmatprep.mubr.msk.f32.mxu0 %vm1699_vm2, %v1700_v9 }
 0x851   :  { %1580 = vmatprep.subr.bf16.mxu0 %v1698_v3 }
 0x854   :  { %1582 = vmatpush3.bf16.msra.mxu0 %v1775_v10 }
 0x855   :  { %1589 = vmatprep.subr.bf16.mxu0 %v1698_v3 }
 0x922   :  { %v523_v14 = vpop.f32.mrb[2].mxu0 }
 0x923   :  { %v528_v16 = vrot.slane %v523_v14, 2  ;;  %v1470_v17 = vpop.f32.mrb[3].mxu0 }
 0x925   :  { %v530_v18 = vadd.f32 %v528_v16, %v1798_v15 }
 0x927   :  { %1658 = vtanh.f32 %v530_v18  ;;  %v1348_v20 = vmul.f32 -1.442695, %v530_v18 }
 0x929   :  { %1660 = vpow2.f32 %v1348_v20 }
 0x931   :  { %v1659_v19 = vpop.eup %1658 }
 0x932   :  { %543 = vrot.lane.b32.xlu0 %v1659_v19, %s1701_s14 }
 0x933   :  { %v1661_v21 = vpop.eup %1660 }
 0x934   :  { %v534_v22 = vadd.f32 1.0, %v1661_v21 }
 0x936   :  { %1662 = vrcp.f32 %v534_v22 }
 0x940   :  { %v1663_v23 = vpop.eup %1662 }
 0x941   :  { %v541_v27 = vmul.f32 %v1663_v23, %v539_v26 }
 0x9a4   :  { %v544_v24 = vpop.permute.xlu0 %543 }
 0x9a5   :  { %v546_v25 = vmul.f32 %v1663_v23, %v544_v24 }
 0x9a7   :  { %548 = vrot.lane.b32.xlu1 %v546_v25, %s1701_s14 }
 0xa19   :  { %v549_v28 = vpop.permute.xlu1 %548 }
 0xa1a   :  { %v551_v29 = vadd.f32 %v549_v28, %v541_v27 }
 0xa1c   :  { %1664 = vtanh.f32 %v551_v29  ;;  %v648_v44 = vrot.slane %v551_v29, 6 }
 0xa26   :  { %v1665_v15 = vpop.eup %1664 }
 0xa27   :  { %554 = vrot.lane.b32.xlu0 %v1665_v15, %s1701_s14 }
 0xa99   :  { %v555_v30 = vpop.permute.xlu0 %554 }
 0xa9a   :  { %v1847_v31 = vmul.f32 %v1663_v23, %v555_v30 }
 0xa9c   :  { %v564_v32 = vrot.slane %v1847_v31, 6 }
 0xa9e   :  { %565 = vrot.lane.b32.xlu1 %v564_v32, %s1702_s3 }
 0xb10   :  { %v566_v33 = vpop.permute.xlu1 %565 }
 0xb11   :  { %1480 = vmatmul.mubr.msk.f32.vlgmr.msra.gmra.mrb[6].mxu1 %vm126_vm4, %v566_v33 }
 0xb12   :  { %1585 = vmatpush3.bf16.msra.mxu1 %v1765_v7  ;;  %1501 = vmatprep.mubr.msk.f32.mxu1 %vm1699_vm2, %v1700_v9 }
 0xb13   :  { %1586 = vmatprep.subr.bf16.mxu1 %v1698_v3 }
 0xb16   :  { %1588 = vmatpush3.bf16.msra.mxu1 %v1775_v10 }
 0xbe4   :  { %v635_v34 = vpop.f32.mrb[6].mxu1 }
 0xbe5   :  { %v639_v35 = vadd.f32 %v635_v34, %v1796_v13  ;;  %v1481_v36 = vpop.f32.mrb[7].mxu1 }
 0xbe7   :  { %1666 = vtanh.f32 %v639_v35  ;;  %v1350_v38 = vmul.f32 -1.442695, %v639_v35 }
 0xbe9   :  { %1668 = vpow2.f32 %v1350_v38 }
 0xbf1   :  { %v1667_v37 = vpop.eup %1666 }
 0xbf2   :  { %652 = vrot.lane.b32.xlu0 %v1667_v37, %s1701_s14 }
 0xbf3   :  { %v1669_v39 = vpop.eup %1668 }
 0xbf4   :  { %v643_v40 = vadd.f32 1.0, %v1669_v39 }
 0xbf6   :  { %1670 = vrcp.f32 %v643_v40 }
 0xc00   :  { %v1671_v41 = vpop.eup %1670 }
 0xc01   :  { %v650_v45 = vmul.f32 %v1671_v41, %v648_v44 }
 0xc64   :  { %v653_v42 = vpop.permute.xlu0 %652 }
 0xc65   :  { %v655_v43 = vmul.f32 %v1671_v41, %v653_v42 }
 0xc67   :  { %657 = vrot.lane.b32.xlu1 %v655_v43, %s1701_s14 }
 0xcd9   :  { %v658_v46 = vpop.permute.xlu1 %657 }
 0xcda   :  { %v660_v47 = vadd.f32 %v658_v46, %v650_v45 }
 0xcdc   :  { %1672 = vtanh.f32 %v660_v47 }
 0xce6   :  { %v1673_v48 = vpop.eup %1672 }
 0xce7   :  { %663 = vrot.lane.b32.xlu0 %v1673_v48, %s1701_s14 }
 0xd59   :  { %v664_v49 = vpop.permute.xlu0 %663 }
 0xd5a   :  { %v666_v51 = vmul.f32 %v1671_v41, %v664_v49 }
 0xd5c   :  { %668 = vrot.lane.b32.xlu1 %v666_v51, %s1702_s3 }
 0xdce   :  { %v669_v52 = vpop.permute.xlu1 %668 }
 0xdcf   :  { %671 = vst.msk [vmem:[#allocation2 + $0x8] sm:$0x3] %vm229_vm3, %v669_v52  ;;  %1491 = vmatmul.mubr.msk.f32.vlgmr.msra.gmra.mrb[4].mxu0 %vm126_vm4, %v669_v52  ;;  %v1005_v52 = vld [vmem:[%s1949_s4 + $0x8] sm:$0xff] }
 0xdd0   :  { %1591 = vmatpush3.bf16.msra.mxu0 %v1765_v7  ;;  %1512 = vmatprep.mubr.msk.f32.mxu0 %vm1699_vm2, %v1700_v9 }
 0xdd1   :  { %1592 = vmatprep.subr.bf16.mxu0 %v1698_v3 }
 0xdd4   :  { %1594 = vmatpush3.bf16.msra.mxu0 %v1775_v10  ;;  %v756_v10 = vrot.slane %v660_v47, 6 }
 0xdd5   :  { %1603 = vmatprep.subr.bf16.mxu0 %v1698_v3 }
 0xea2   :  { %v740_v53 = vpop.f32.mrb[4].mxu0 }
 0xea3   :  { %v745_v54 = vrot.slane %v740_v53, 6  ;;  %v1492_v55 = vpop.f32.mrb[5].mxu0 }
 0xea5   :  { %v747_v56 = vadd.f32 %v745_v54, %v1796_v13  ;;  %v1006_v54 = vld [vmem:[%s1949_s4 + $0x10] sm:$0xff] }
 0xea7   :  { %1674 = vtanh.f32 %v747_v56  ;;  %v1352_v58 = vmul.f32 -1.442695, %v747_v56 }
 0xea9   :  { %1676 = vpow2.f32 %v1352_v58 }
 0xeb1   :  { %v1675_v57 = vpop.eup %1674 }
 0xeb2   :  { %760 = vrot.lane.b32.xlu0 %v1675_v57, %s1701_s14 }
 0xeb3   :  { %v1677_v7 = vpop.eup %1676 }
 0xeb4   :  { %v751_v59 = vadd.f32 1.0, %v1677_v7 }
 0xeb6   :  { %1678 = vrcp.f32 %v751_v59 }
 0xec0   :  { %v1679_v60 = vpop.eup %1678 }
 0xec1   :  { %v758_v63 = vmul.f32 %v1679_v60, %v756_v10 }
 0xf24   :  { %v761_v61 = vpop.permute.xlu0 %760 }
 0xf25   :  { %v763_v62 = vmul.f32 %v1679_v60, %v761_v61 }
 0xf27   :  { %765 = vrot.lane.b32.xlu1 %v763_v62, %s1701_s14 }
 0xf99   :  { %v766_v0 = vpop.permute.xlu1 %765 }
 0xf9a   :  { %v768_v1 = vadd.f32 %v766_v0, %v758_v63 }
 0xf9c   :  { %1680 = vtanh.f32 %v768_v1  ;;  %v867_v25 = vrot.slane %v768_v1, 6  ;;  %v1090_v1 = vld [vmem:[%s1950_s5] sm:$0x3f] }
 0xfa6   :  { %v1681_v2 = vpop.eup %1680 }
 0xfa7   :  { %771 = vrot.lane.b32.xlu0 %v1681_v2, %s1701_s14 }
0x1019   :  { %v772_v4 = vpop.permute.xlu0 %771 }
0x101a   :  { %v1874_v5 = vmul.f32 %v1679_v60, %v772_v4 }
0x101c   :  { %v780_v6 = vrot.slane %v1874_v5, 2 }
0x101e   :  { %781 = vrot.lane.b32.xlu1 %v780_v6, %s1702_s3 }
0x1090   :  { %v782_v11 = vpop.permute.xlu1 %781 }
0x1091   :  { %1502 = vmatmul.mubr.msk.f32.vlgmr.msra.gmra.mrb[8].mxu1 %vm126_vm4, %v782_v11 }
0x1164   :  { %v851_v12 = vpop.f32.mrb[8].mxu1 }
0x1165   :  { %v856_v14 = vrot.slane %v851_v12, 4  ;;  %v1503_v16 = vpop.f32.mrb[9].mxu1 }
0x1166   :  { %v1360_v16 = vld [vmem:[%s1950_s5 + $0x8] sm:$0x3f] }
0x1167   :  { %v858_v17 = vadd.f32 %v856_v14, %v1796_v13 }
0x1169   :  { %1682 = vtanh.f32 %v858_v17  ;;  %v1354_v19 = vmul.f32 -1.442695, %v858_v17 }
0x116b   :  { %1684 = vpow2.f32 %v1354_v19  ;;  %v1089_v19 = vld [vmem:[%s1951_s6] sm:$0x3f] }
0x1173   :  { %v1683_v18 = vpop.eup %1682 }
0x1174   :  { %871 = vrot.lane.b32.xlu0 %v1683_v18, %s1701_s14  ;;  %v1362_v18 = vld [vmem:[%s1950_s5 + $0x10] sm:$0x3f] }
0x1175   :  { %v1685_v20 = vpop.eup %1684 }
0x1176   :  { %v862_v21 = vadd.f32 1.0, %v1685_v20 }
0x1178   :  { %1686 = vrcp.f32 %v862_v21 }
0x1182   :  { %v1687_v22 = vpop.eup %1686 }
0x1183   :  { %v869_v26 = vmul.f32 %v1687_v22, %v867_v25 }
0x11e6   :  { %v872_v23 = vpop.permute.xlu0 %871 }
0x11e7   :  { %v874_v24 = vmul.f32 %v1687_v22, %v872_v23 }
0x11e9   :  { %876 = vrot.lane.b32.xlu1 %v874_v24, %s1701_s14 }
0x125b   :  { %v877_v27 = vpop.permute.xlu1 %876 }
0x125c   :  { %v879_v28 = vadd.f32 %v877_v27, %v869_v26 }
0x125e   :  { %1688 = vtanh.f32 %v879_v28 }
0x1268   :  { %v1689_v29 = vpop.eup %1688 }
0x1269   :  { %882 = vrot.lane.b32.xlu0 %v1689_v29, %s1701_s14 }
0x12db   :  { %v883_v15 = vpop.permute.xlu0 %882 }
0x12dc   :  { %v885_v30 = vmul.f32 %v1687_v22, %v883_v15 }
0x12de   :  { %v891_v32 = vrot.slane %v885_v30, 4 }
0x12e0   :  { %892 = vrot.lane.b32.xlu1 %v891_v32, %s1702_s3 }
0x1352   :  { %v893_v33 = vpop.permute.xlu1 %892 }
0x1353   :  { %1513 = vmatmul.mubr.msk.f32.vlgmr.msra.gmra.mrb[6].mxu0 %vm126_vm4, %v893_v33 }
0x1354   :  { %1530 = vmatprep.mubr.msk.f32.mxu0 %vm1699_vm2, %v1700_v9 }
0x1426   :  { %v962_v34 = vpop.f32.mrb[6].mxu0 }
0x1427   :  { %v967_v35 = vrot.slane %v962_v34, 2  ;;  %v1514_v36 = vpop.f32.mrb[7].mxu0 }
0x1429   :  { %v969_v37 = vadd.f32 %v967_v35, %v1796_v13  ;;  %v978_v13 = vrot.slane %v879_v28, 6 }
0x142b   :  { %1690 = vtanh.f32 %v969_v37  ;;  %v1356_v39 = vmul.f32 -1.442695, %v969_v37 }
0x142d   :  { %1692 = vpow2.f32 %v1356_v39 }
0x1435   :  { %v1691_v38 = vpop.eup %1690 }
0x1436   :  { %982 = vrot.lane.b32.xlu0 %v1691_v38, %s1701_s14 }
0x1437   :  { %v1693_v40 = vpop.eup %1692 }
0x1438   :  { %v973_v41 = vadd.f32 1.0, %v1693_v40 }
0x143a   :  { %1694 = vrcp.f32 %v973_v41 }
0x1444   :  { %v1695_v42 = vpop.eup %1694 }
0x1445   :  { %v980_v45 = vmul.f32 %v1695_v42, %v978_v13 }
0x14a8   :  { %v983_v43 = vpop.permute.xlu0 %982 }
0x14a9   :  { %v985_v44 = vmul.f32 %v1695_v42, %v983_v43 }
0x14ab   :  { %987 = vrot.lane.b32.xlu1 %v985_v44, %s1701_s14 }
0x14af   :  { %335 = vrot.lane.b32.xlu1 %v1817_v50, %s1702_s3 }
0x14b3   :  { %559 = vrot.lane.b32.xlu1 %v1847_v31, %s1702_s3  ;;  %v1004_v31 = vld [vmem:[%s1949_s4] sm:$0xff] }
0x14b4   :  { %v1595_v53 = vpack.c.bf16 %v1005_v52, %v1004_v31 }
0x14b6   :  { %1596 = vmatprep.subr.bf16.mxu1 %v1595_v53 }
0x14b7   :  { %887 = vrot.lane.b32.xlu1 %v885_v30, %s1702_s3  ;;  %1598 = vmatpush3.bf16.msra.mxu1 %v1595_v53 }
0x151d   :  { %v988_v46 = vpop.permute.xlu1 %987 }
0x151e   :  { %v990_v47 = vadd.f32 %v988_v46, %v980_v45 }
0x1520   :  { %1696 = vtanh.f32 %v990_v47 }
0x1521   :  { %v336_v48 = vpop.permute.xlu1 %335 }
0x1522   :  { %339 = vst.msk [vmem:[#allocation2] sm:$0xc] %vm338_vm5, %v336_v48 }
0x1525   :  { %v560_v49 = vpop.permute.xlu1 %559 }
0x1526   :  { %563 = vst.msk [vmem:[#allocation2] sm:$0xc0] %vm562_vm6, %v560_v49 }
0x1529   :  { %v888_v50 = vpop.permute.xlu1 %887 }
0x152a   :  { %v1697_v51 = vpop.eup %1696  ;;  %890 = vst.msk [vmem:[#allocation2 + $0x8] sm:$0x30] %vm450_vm7, %v888_v50 }
0x152b   :  { %993 = vrot.lane.b32.xlu0 %v1697_v51, %s1701_s14 }
0x152f   :  { %447 = vrot.lane.b32.xlu0 %v1832_v8, %s1702_s3  ;;  %v1007_v8 = vld [vmem:[%s1949_s4 + $0x18] sm:$0xff]  ;;  %s1703_s4 = smov 126  }
0x1530   :  { %v1599_v55 = vpack.c.bf16 %v1007_v8, %v1006_v54 }
0x1532   :  { %1600 = vmatprep.subr.bf16.mxu1 %v1599_v55 }
0x1533   :  { %776 = vrot.lane.b32.xlu0 %v1874_v5, %s1702_s3  ;;  %1602 = vmatpush3.bf16.msra.mxu1 %v1599_v55 }
0x159d   :  { %v994_v56 = vpop.permute.xlu0 %993 }
0x159e   :  { %v996_v57 = vmul.f32 %v1695_v42, %v994_v56 }
0x15a0   :  { %998 = vrot.lane.b32.xlu0 %v996_v57, %s1702_s3 }
0x15a1   :  { %v448_v58 = vpop.permute.xlu0 %447 }
0x15a2   :  { %451 = vst.msk [vmem:[#allocation2] sm:$0x30] %vm450_vm7, %v448_v58 }
0x15a5   :  { %v777_v7 = vpop.permute.xlu0 %776 }
0x15a6   :  { %779 = vst.msk [vmem:[#allocation2 + $0x8] sm:$0xc] %vm338_vm5, %v777_v7 }
0x15a9   :  { %v1002_v59 = vld [vmem:[#allocation2] sm:$0xff] }
0x15aa   :  { %1523 = vmatprep.mubr.msk.f32.mxu1 %vm126_vm4, %v1002_v59 }
0x1612   :  { %v999_v60 = vpop.permute.xlu0 %998 }
0x1613   :  { %1001 = vst.msk [vmem:[#allocation2 + $0x8] sm:$0xc0] %vm562_vm6, %v999_v60 }
0x161a   :  { %v1003_v61 = vld [vmem:[#allocation2 + $0x8] sm:$0xff] }
0x161b   :  { %1524 = vmatmul.mubr.msk.f32.vlgmr.msra.gmra.mrb[10].mxu1 %vm126_vm4, %v1003_v61 }
0x16ee   :  { %v1525_v62 = vpop.f32.mrb[10].mxu1 }
0x16ef   :  { %v1080_v10 = vpop.f32.mrb[11].mxu1 }
0x16f0   :  { %v1629_v63 = vpack.i.bf16 %v1525_v62, %v1080_v10  ;;  %v1604_v0 = vpack.c.bf16 %v1525_v62, %v1080_v10 }
0x16f2   :  { %1630 = vrot.lane.b32.xlu0 %v1629_v63, %s1703_s4  ;;  %1625 = vrot.lane.b32.xlu1 %v1629_v63, %s1704_s23 }
0x16f3   :  { %1605 = vmatpush3.bf16.msra.mxu0 %v1604_v0 }
0x16f4   :  { %1606 = vmatprep.subr.bf16.mxu0 %v1698_v3 }
0x16f6   :  { %1531 = vmatmul.mubr.msk.f32.vlgmr.msra.gmra.mrb[8].mxu0 %vm1091_vm8, %v1090_v1 }
0x16f7   :  { %1537 = vmatprep.mubr.msk.f32.mxu0 %vm1699_vm2, %v1700_v9 }
0x1764   :  { %v1631_v2 = vpop.permute.xlu0 %1630  ;;  %v1626_v4 = vpop.permute.xlu1 %1625 }
0x1765   :  { %v1628_v5 = vunpack.i.h.bf16 %v1626_v4  ;;  %v1627_v6 = vunpack.i.l.bf16 %v1626_v4  ;;  %v1633_v11 = vunpack.i.h.bf16 %v1631_v2  ;;  %v1632_v12 = vunpack.i.l.bf16 %v1631_v2 }
0x1767   :  { %v1607_v14 = vpack.c.bf16 %v1628_v5, %v1627_v6  ;;  %v1610_v17 = vpack.c.bf16 %v1633_v11, %v1632_v12 }
0x1769   :  { %1608 = vmatpush3.bf16.msra.mxu0 %v1607_v14 }
0x176a   :  { %1609 = vmatprep.subr.bf16.mxu0 %v1698_v3 }
0x176c   :  { %1538 = vmatmul.mubr.msk.f32.vlgmr.msra.gmra.mrb[8].mxu0 %vm1091_vm8, %v1360_v16 }
0x176d   :  { %1611 = vmatpush3.bf16.msra.mxu0 %v1610_v17  ;;  %1544 = vmatprep.mubr.msk.f32.mxu0 %vm1699_vm2, %v1700_v9 }
0x1774   :  { %1545 = vmatmul.mubr.msk.f32.vlgmr.msra.gmra.mrb[8].mxu0 %vm1091_vm8, %v1362_v18 }
0x1847   :  { %v1327_v20 = vpop.f32.mrb[8].mxu0 }
0x1848   :  { %v1612_v3 = vadd.f32 %v1327_v20, %v1089_v19  ;;  %v1546_v21 = vpop.f32.mrb[9].mxu0 }
0x184a   :  { %1333 = vst.msk [vmem:[%s1952_s7] sm:$0x3f] %vm1332_vm9, %v1612_v3 }

</bundles_post_ra>
